<compile_context>
chip_gen: v5e
topology: v5e:2x2
jax: 0.10.0
libtpu: 0.0.40
codegen_flags: <defaults>
</compile_context>

<pallas_src>
import functools

import jax
import jax.numpy as jnp
from jax.experimental import pallas as pl
from jax.experimental.pallas import tpu as pltpu


# ---------------------------------------------------------------------------
# Kernel
# ---------------------------------------------------------------------------
def _nnnet_kernel(x_ref, wcat_ref, bcat_ref, out_ref, *, layer_dims, row_offsets):
    """MLP on one batch tile, computed feature-major (batch on the lane axis).

    x_ref   : (tile_b, in_0)          batch-major tile, straight from HBM
    wcat_ref: (sum_out_pad, max_in)   row-packed transposed weights (out_i, in_i)
    bcat_ref: (sum_out_pad, 1)        row-packed biases
    out_ref : (tile_b, outputs)       batch-major output tile
    """
    # One in-kernel transpose (XLU; idle slot here) puts the 128-wide batch
    # tile on the lane axis for all matmuls and elementwise work.
    h = x_ref[...].astype(jnp.float32).T                       # (in_0, tile_b)

    num_linear = len(layer_dims)
    for li, (in_i, out_i) in enumerate(layer_dims):
        off = row_offsets[li]
        w = wcat_ref[off:off + out_i, 0:in_i]                  # (out_i, in_i), static slice
        b = bcat_ref[off:off + out_i, :]                       # (out_i, 1)
        # MXU matmul: N dimension is the lane-dense batch tile.
        h = jnp.dot(w, h, preferred_element_type=jnp.float32) + b
        if li != num_linear - 1:
            h = jnp.maximum(h, 0.0)                            # ReLU on hidden layers only

    # NNNet: sigmoid(backbone(x) * 5); transpose the small (outputs, tile_b)
    # result back to batch-major for the store (outputs << 128, tiny traffic).
    y = jax.nn.sigmoid(h * 5.0)                                # (outputs, tile_b)
    out_ref[...] = y.T.astype(out_ref.dtype)                   # (tile_b, outputs)


# ---------------------------------------------------------------------------
# Tiling policy
# ---------------------------------------------------------------------------
def _round_up(x, m):
    return ((x + m - 1) // m) * m


def _tpu_generation_info():
    """Return (vmem_bytes_per_core, num_tensorcores); conservative on failure."""
    try:
        vmem = int(pltpu.get_tpu_info().vmem_capacity_bytes)
    except Exception:
        vmem = 64 << 20  # assume the smallest (v7x-like) VMEM if query fails
    # v7x exposes 64 MiB VMEM per TensorCore and has 2 TCs/chip; v5e/v6e: 128 MiB, 1 TC.
    num_tc = 2 if vmem <= (64 << 20) else 1
    return vmem, num_tc


def _pick_tile_b(batch, in0, outputs, max_width, param_bytes, num_tc):
    """Largest lane-dense batch tile bounded by vreg + VMEM budgets, generation-aware."""
    # (a) keep the live activation (max_width x tile_b x 4B) within ~32 vregs (128 KiB)
    #     so the fully unrolled layer loop doesn't spill h between layers.
    vreg_cap = max(128, (((128 * 1024) // (4 * max_width)) // 128) * 128)
    # (b) double-buffered x/out blocks + a few working slabs comfortably under
    #     ~12 MiB (below v5e's 16 MiB scoped-VMEM default; v6e/v7x allow >= 32 MiB).
    per_b_bytes = 4 * (2 * (in0 + outputs) + 4 * max_width)
    vmem_cap = max(128, (((12 * 1024 * 1024 - 2 * param_bytes) // per_b_bytes) // 128) * 128)
    cap = min(vreg_cap, vmem_cap)

    b_eff = _round_up(batch, 128)
    # Minimum steps that respect the tile cap; on v7x also insist on feeding
    # both TensorCores (even grid) whenever the batch allows it.
    steps = max(pl.cdiv(b_eff, cap), num_tc if b_eff >= num_tc * 128 else 1)
    if num_tc > 1 and steps > 1:
        steps = _round_up(steps, num_tc)
    tile_b = min(cap, _round_up(pl.cdiv(b_eff, steps), 128))
    return tile_b


# ---------------------------------------------------------------------------
# Parameter packing
# ---------------------------------------------------------------------------
def _pack_params(weights, biases):
    """Transpose weights to (out, in), pad rows to multiples of 8, pack into one buffer each."""
    wts = [jnp.asarray(w).T for w in weights]                  # (out_i, in_i)
    layer_dims = tuple((int(w.shape[1]), int(w.shape[0])) for w in wts)
    # Keep max_in at the true max input width (hardware zero-pads K into the MXU;
    # widening the lane dim would only add DMA bytes).
    max_in = max(in_i for in_i, _ in layer_dims)
    w_rows, b_rows, row_offsets = [], [], []
    off = 0
    for w, b in zip(wts, biases):
        out_i, in_i = w.shape
        pad_rows = (-out_i) % 8                                # keep row offsets sublane-aligned
        w_rows.append(jnp.pad(w, ((0, pad_rows), (0, max_in - in_i))))
        b_rows.append(jnp.pad(jnp.asarray(b).reshape(-1, 1), ((0, pad_rows), (0, 0))))
        row_offsets.append(off)
        off += out_i + pad_rows
    wcat = jnp.concatenate(w_rows, axis=0).astype(jnp.float32)     # (sum_out_pad, max_in)
    bcat = jnp.concatenate(b_rows, axis=0).astype(jnp.float32)     # (sum_out_pad, 1)
    return wcat, bcat, layer_dims, tuple(row_offsets)


# ---------------------------------------------------------------------------
# Wrapper
# ---------------------------------------------------------------------------
def nnnet_forward(x, weights, biases, *, tile_b=None):
    """x: (B, inputs) float32. weights[i]: (in_i, out_i). biases[i]: (out_i,)."""
    B, in0 = x.shape
    outputs = int(weights[-1].shape[1])

    wcat, bcat, layer_dims, row_offsets = _pack_params(weights, biases)
    max_width = max(max(in_i, out_i) for in_i, out_i in layer_dims)
    param_bytes = 4 * (int(wcat.size) + int(bcat.size))

    _, num_tc = _tpu_generation_info()
    if tile_b is None:
        tile_b = _pick_tile_b(B, in0, outputs, max_width, param_bytes, num_tc)
    assert tile_b % 128 == 0, "tile_b must be a multiple of 128 (lane-dense)"

    # Pad the batch up to a multiple of tile_b (only a real op for ragged batches);
    # padded rows are computed and discarded via the final slice.
    b_pad = _round_up(B, tile_b)
    x_in = x.astype(jnp.float32)
    if b_pad != B:
        x_in = jnp.pad(x_in, ((0, b_pad - B), (0, 0)))

    grid = (b_pad // tile_b,)
    kernel = functools.partial(
        _nnnet_kernel, layer_dims=layer_dims, row_offsets=row_offsets)

    flops = 2 * b_pad * sum(i * o for i, o in layer_dims)
    bytes_accessed = 4 * (b_pad * in0 + b_pad * outputs + int(wcat.size) + int(bcat.size))
    cost = pl.CostEstimate(
        flops=flops, transcendentals=b_pad * outputs, bytes_accessed=bytes_accessed)

    out = pl.pallas_call(
        kernel,
        out_shape=jax.ShapeDtypeStruct((b_pad, outputs), jnp.float32),
        grid_spec=pltpu.PrefetchScalarGridSpec(
            num_scalar_prefetch=0,
            grid=grid,
            in_specs=[
                # Batch-major activation tile straight from HBM (no wrapper transpose).
                pl.BlockSpec((tile_b, in0), lambda i: (i, 0)),
                # Packed weights / biases: one grid-invariant block each
                # (constant index_map => fetched once, no per-step re-DMA).
                pl.BlockSpec(wcat.shape, lambda i: (0, 0)),
                pl.BlockSpec(bcat.shape, lambda i: (0, 0)),
            ],
            # Batch-major output tile; outputs (=16) equals the full array width.
            out_specs=pl.BlockSpec((tile_b, outputs), lambda i: (i, 0)),
        ),
        compiler_params=pltpu.CompilerParams(
            dimension_semantics=("parallel",),   # batch axis is embarrassingly parallel
        ),
        cost_estimate=cost,
    )(x_in, wcat, bcat)

    return out[:B] if b_pad != B else out


# ---------------------------------------------------------------------------
# Reference + test harness
# ---------------------------------------------------------------------------
def init_fcblock_params(key, hidden, layers, inputs, outputs):
    """Deterministic synthetic params matching FCBlock(hidden, layers, inputs, outputs)."""
    dims = [inputs] + [hidden] * layers + [outputs]
    weights, biases = [], []
    for i in range(len(dims) - 1):
        key, wk, bk = jax.random.split(key, 3)
        fan_in = dims[i]
        scale = 1.0 / jnp.sqrt(jnp.float32(fan_in))
        weights.append(
            jax.random.uniform(wk, (dims[i], dims[i + 1]), jnp.float32, -scale, scale))
        biases.append(
            jax.random.uniform(bk, (dims[i + 1],), jnp.float32, -scale, scale))
    return weights, biases


def nnnet_reference(x, weights, biases):
    h = x
    for i, (w, b) in enumerate(zip(weights, biases)):
        h = h @ w + b
        if i != len(weights) - 1:
            h = jnp.maximum(h, 0.0)
    return jax.nn.sigmoid(h * 5.0)


if __name__ == "__main__":
    # NNNet(hidden=32, layers=2, inputs=32, outputs=16).
    hidden, layers, inputs, outputs = 32, 2, 32, 16

    key = jax.random.PRNGKey(0)
    key, xk = jax.random.split(key)
    weights, biases = init_fcblock_params(key, hidden, layers, inputs, outputs)

    # Aligned batch: no padding, no wrapper transposes -> single kernel launch.
    batch = 256
    x = jax.random.normal(xk, (batch, inputs), jnp.float32)
    out = jax.block_until_ready(nnnet_forward(x, weights, biases))
    ref = nnnet_reference(x, weights, biases)
    assert out.shape == (batch, outputs), out.shape
    err = float(jnp.max(jnp.abs(out - ref)))
    assert err < 1e-4, err

    # Ragged batch: exercises the pad-and-slice path (no full-batch fallback).
    batch2 = 200
    x2 = x[:batch2]
    out2 = jax.block_until_ready(nnnet_forward(x2, weights, biases))
    ref2 = nnnet_reference(x2, weights, biases)
    assert out2.shape == (batch2, outputs), out2.shape
    err2 = float(jnp.max(jnp.abs(out2 - ref2)))
    assert err2 < 1e-4, err2

    print("KERNEL_OK")
</pallas_src>

<mosaic_0001>
module attributes {stable_mosaic.version = 11 : i64} {
  func.func @_nnnet_kernel(%arg0: i32, %arg1: memref<128x32xf32, #tpu.memory_space<vmem>>, %arg2: memref<80x32xf32, #tpu.memory_space<vmem>>, %arg3: memref<80x1xf32, #tpu.memory_space<vmem>>, %arg4: memref<128x16xf32, #tpu.memory_space<vmem>>) attributes {dimension_semantics = [#tpu.dimension_semantics<parallel>], iteration_bounds = array<i64: 2>, scalar_prefetch = 0 : i64, scratch_operands = 0 : i64, tpu.core_type = #tpu.core_type<tc>, window_params = [{transform_indices = @transform_0, window_bounds = array<i64: 128, 32>}, {pipeline_mode = #tpu.pipeline_mode<synchronous>, transform_indices = @transform_1, window_bounds = array<i64: 80, 32>}, {pipeline_mode = #tpu.pipeline_mode<synchronous>, transform_indices = @transform_2, window_bounds = array<i64: 80, 1>}, {transform_indices = @transform_3, window_bounds = array<i64: 128, 16>}]} {
    %c0 = arith.constant 0 : index
    %c0_0 = arith.constant 0 : index
    %0 = vector.load %arg1[%c0, %c0_0] : memref<128x32xf32, #tpu.memory_space<vmem>>, vector<128x32xf32>
    %1 = tpu.transpose %0, [1, 0] : vector<128x32xf32> -> vector<32x128xf32>
    %c0_1 = arith.constant 0 : index
    %c0_2 = arith.constant 0 : index
    %2 = vector.load %arg2[%c0_1, %c0_2] : memref<80x32xf32, #tpu.memory_space<vmem>>, vector<32x32xf32>
    %c0_3 = arith.constant 0 : index
    %c0_4 = arith.constant 0 : index
    %3 = vector.load %arg3[%c0_3, %c0_4] : memref<80x1xf32, #tpu.memory_space<vmem>>, vector<32x1xf32>
    %cst = arith.constant dense<0.000000e+00> : vector<32x128xf32>
    %4 = tpu.matmul %2, %1, %cst {dimension_numbers = #tpu.dot_dimension_numbers<[1], [0], [0], [1], [0, 0, 1, 1], [], []>} : vector<32x32xf32>, vector<32x128xf32>, vector<32x128xf32> -> vector<32x128xf32>
    %5 = vector.broadcast %3 : vector<32x1xf32> to vector<32x128xf32>
    %6 = arith.addf %4, %5 : vector<32x128xf32>
    %cst_5 = arith.constant 0.000000e+00 : f32
    %7 = vector.broadcast %cst_5 : f32 to vector<32x128xf32>
    %8 = arith.maximumf %6, %7 : vector<32x128xf32>
    %c32 = arith.constant 32 : index
    %c0_6 = arith.constant 0 : index
    %9 = vector.load %arg2[%c32, %c0_6] : memref<80x32xf32, #tpu.memory_space<vmem>>, vector<32x32xf32>
    %c32_7 = arith.constant 32 : index
    %c0_8 = arith.constant 0 : index
    %10 = vector.load %arg3[%c32_7, %c0_8] : memref<80x1xf32, #tpu.memory_space<vmem>>, vector<32x1xf32>
    %cst_9 = arith.constant dense<0.000000e+00> : vector<32x128xf32>
    %11 = tpu.matmul %9, %8, %cst_9 {dimension_numbers = #tpu.dot_dimension_numbers<[1], [0], [0], [1], [0, 0, 1, 1], [], []>} : vector<32x32xf32>, vector<32x128xf32>, vector<32x128xf32> -> vector<32x128xf32>
    %12 = vector.broadcast %10 : vector<32x1xf32> to vector<32x128xf32>
    %13 = arith.addf %11, %12 : vector<32x128xf32>
    %cst_10 = arith.constant 0.000000e+00 : f32
    %14 = vector.broadcast %cst_10 : f32 to vector<32x128xf32>
    %15 = arith.maximumf %13, %14 : vector<32x128xf32>
    %c64 = arith.constant 64 : index
    %c0_11 = arith.constant 0 : index
    %16 = vector.load %arg2[%c64, %c0_11] : memref<80x32xf32, #tpu.memory_space<vmem>>, vector<16x32xf32>
    %c64_12 = arith.constant 64 : index
    %c0_13 = arith.constant 0 : index
    %17 = vector.load %arg3[%c64_12, %c0_13] : memref<80x1xf32, #tpu.memory_space<vmem>>, vector<16x1xf32>
    %cst_14 = arith.constant dense<0.000000e+00> : vector<16x128xf32>
    %18 = tpu.matmul %16, %15, %cst_14 {dimension_numbers = #tpu.dot_dimension_numbers<[1], [0], [0], [1], [0, 0, 1, 1], [], []>} : vector<16x32xf32>, vector<32x128xf32>, vector<16x128xf32> -> vector<16x128xf32>
    %19 = vector.broadcast %17 : vector<16x1xf32> to vector<16x128xf32>
    %20 = arith.addf %18, %19 : vector<16x128xf32>
    %cst_15 = arith.constant 5.000000e+00 : f32
    %21 = vector.broadcast %cst_15 : f32 to vector<16x128xf32>
    %22 = arith.mulf %20, %21 : vector<16x128xf32>
    %23 = arith.negf %22 : vector<16x128xf32>
    %24 = math.exp %23 : vector<16x128xf32>
    %cst_16 = arith.constant 1.000000e+00 : f32
    %25 = vector.broadcast %cst_16 : f32 to vector<16x128xf32>
    %26 = arith.addf %25, %24 : vector<16x128xf32>
    %27 = arith.divf %25, %26 : vector<16x128xf32>
    %28 = tpu.transpose %27, [1, 0] : vector<16x128xf32> -> vector<128x16xf32>
    %c0_17 = arith.constant 0 : index
    %c0_18 = arith.constant 0 : index
    %29 = vector.load %arg4[%c0_17, %c0_18] : memref<128x16xf32, #tpu.memory_space<vmem>>, vector<128x16xf32>
    tpu.vector_store %arg4[%c0_17, %c0_18], %28 {strides = array<i32>} : memref<128x16xf32, #tpu.memory_space<vmem>>, vector<128x16xf32>,
    return
  }
  func.func @transform_0(%arg0: i32) -> (i32, i32) {
    %c0_i32 = arith.constant 0 : i32
    %c0_i32_0 = arith.constant 0 : i32
    return %arg0, %c0_i32 : i32, i32
  }
  func.func @transform_1(%arg0: i32) -> (i32, i32) {
    %c0_i32 = arith.constant 0 : i32
    %c0_i32_0 = arith.constant 0 : i32
    %c0_i32_1 = arith.constant 0 : i32
    return %c0_i32, %c0_i32_0 : i32, i32
  }
  func.func @transform_2(%arg0: i32) -> (i32, i32) {
    %c0_i32 = arith.constant 0 : i32
    %c0_i32_0 = arith.constant 0 : i32
    %c0_i32_1 = arith.constant 0 : i32
    return %c0_i32, %c0_i32_0 : i32, i32
  }
  func.func @transform_3(%arg0: i32) -> (i32, i32) {
    %c0_i32 = arith.constant 0 : i32
    %c0_i32_0 = arith.constant 0 : i32
    return %arg0, %c0_i32 : i32, i32
  }
}

</mosaic_0001>

<bundles_post_ra>
// kernel: tpu_custom_call.1
= control target key start
LH: loop header
LB: loop body
LE: loop exit
PB: predicated region body
PF: predicated region fallthrough
CT: control target
= control target key end

     0   :  { %s678_s12 = smov 0   ;;  %s856_s0 = inlined_call_operand.vmem [shape: f32[256,32], index: 0, kind: input, shape index: {}]   ;;  %s857_s1 = inlined_call_operand.vmem [shape: f32[80,32], index: 1, kind: input, shape index: {}]   ;;  %s858_s2 = inlined_call_operand.vmem [shape: f32[80,1], index: 2, kind: input, shape index: {}]   ;;  %s859_s3 = inlined_call_operand.vmem [shape: f32[256,16], index: 3, kind: output, shape index: {}]  }
   0x1 LB: > { %s573_s13 = sadd.s32 4294967295, %s655_s12   ;;  %p577_p0 = scmp.ge.s32.totalorder %s655_s12, 1  ;;  %s655_s12 = sphi %s678_s12, %s13_s12  }
   0x2   : > { %p138_p1 = scmp.lt.s32.totalorder %s655_s12, 3 }
   0x4   : > { %p139_p2 = pnand %p577_p0, %p138_p1 }
   0x5   : > { %s578_s14 = sshll.u32 (!%p139_p2), %s573_s13, 4 }
   0x6   : > { %142 = sbr.rel (%p139_p2) target bundleno = 848 (0x350), region = 32  ;;  %p163_p3 = scmp.lt.s32.totalorder (!%p139_p2), %s578_s14, 31 }
   0xb   : > { %s861_s14 = smov (!%p163_p3, %s578_s14), 31  ;;  %vm218_vm0 = vcmask 261120   ;;  %v197_v9 = vld [vmem:[%s858_s2 + $0x18] sm:$0xff]  ;;  %v657_v11 = vmov 0   ;;  %v196_v13 = vld [vmem:[%s858_s2 + $0x10] sm:$0xff]  ;;  %v195_v14 = vld [vmem:[%s858_s2 + $0x8] sm:$0xff] }
   0xc   : > { %s579_s15 = sshll.u32 %s861_s14, 3  ;;  %638 = vset.pattern.permute.xlu0 %v657_v11  ;;  %639 = vset.pattern.permute.xlu1 %v657_v11  ;;  %v317_v17 = vld [vmem:[%s858_s2 + $0x28] sm:$0xff]  ;;  %v194_v18 = vld [vmem:[%s858_s2] sm:$0xff]  ;;  %v192_v26 = vld [vmem:[%s857_s1 + $0x10] sm:$0xff]  ;;  %vm500_vm9 = vcmask 130048  }
   0xd   : > { %s694_s18 = scalar_lea.vmem %s856_s0, %s579_s15  ;;  %215 = vperm.xlu0 %638, %v197_v9   ;;  %640 = vset.pattern.permute.xlu2 %v657_v11  ;;  %v316_v21 = vld [vmem:[%s858_s2 + $0x20] sm:$0xff]  ;;  %v388_v22 = vld [vmem:[%s858_s2 + $0x48] sm:$0xff]  ;;  %v193_v27 = vld [vmem:[%s857_s1 + $0x18] sm:$0xff]  ;;  %s819_s10 = scalar_lea.vmem %s859_s3, %s579_s15 }
   0xe   : > { %v189_v0 = vld [vmem:[%s694_s18 + $0x78] sm:$0xff]  ;;  %v188_v1 = vld [vmem:[%s694_s18 + $0x70] sm:$0xff]  ;;  %v187_v2 = vld [vmem:[%s694_s18 + $0x68] sm:$0xff]  ;;  %205 = vperm.xlu1 %639, %v195_v14  }
   0xf   : > { %612 = vmatpush.xpose.msk.msra.mxu3 %vm218_vm0, %v189_v0  ;;  %582 = vmatpush.xpose.msk.msra.mxu0 %vm218_vm0, %v189_v0  ;;  %v186_v3 = vld [vmem:[%s694_s18 + $0x60] sm:$0xff]  ;;  %v185_v4 = vld [vmem:[%s694_s18 + $0x58] sm:$0xff]  ;;  %v184_v5 = vld [vmem:[%s694_s18 + $0x50] sm:$0xff] }
  0x10   : > { %v183_v6 = vld [vmem:[%s694_s18 + $0x48] sm:$0xff]  ;;  %v182_v7 = vld [vmem:[%s694_s18 + $0x40] sm:$0xff]  ;;  %v181_v8 = vld [vmem:[%s694_s18 + $0x38] sm:$0xff] }
  0x11   : > { %v180_v10 = vld [vmem:[%s694_s18 + $0x30] sm:$0xff]  ;;  %v179_v12 = vld [vmem:[%s694_s18 + $0x28] sm:$0xff]  ;;  %v178_v15 = vld [vmem:[%s694_s18 + $0x20] sm:$0xff] }
  0x12   : > { %v177_v16 = vld [vmem:[%s694_s18 + $0x18] sm:$0xff]  ;;  %v176_v19 = vld [vmem:[%s694_s18 + $0x10] sm:$0xff]  ;;  %v175_v20 = vld [vmem:[%s694_s18 + $0x8] sm:$0xff] }
  0x13   : > { %613 = vmatpush.xpose.msk.msra.mxu3 %vm218_vm0, %v188_v1  ;;  %583 = vmatpush.xpose.msk.msra.mxu0 %vm218_vm0, %v188_v1  ;;  %v174_v23 = vld [vmem:[%s694_s18] sm:$0xff]  ;;  %v191_v24 = vld [vmem:[%s857_s1 + $0x8] sm:$0xff]  ;;  %v319_v40 = vld [vmem:[%s858_s2 + $0x38] sm:$0xff] }
  0x14   : > { %v190_v25 = vld [vmem:[%s857_s1] sm:$0xff]  ;;  %337 = vperm.xlu2 %640, %v319_v40   ;;  %v318_v46 = vld [vmem:[%s858_s2 + $0x30] sm:$0xff]  ;;  %v313_v47 = vld [vmem:[%s857_s1 + $0x28] sm:$0xff] }
  0x15   : > { %210 = vperm.xlu0 %638, %v196_v13   ;;  %v312_v45 = vld [vmem:[%s857_s1 + $0x20] sm:$0xff]  ;;  %v314_v49 = vld [vmem:[%s857_s1 + $0x30] sm:$0xff]  ;;  %v315_v50 = vld [vmem:[%s857_s1 + $0x38] sm:$0xff] }
  0x16   : > { %200 = vperm.xlu1 %639, %v194_v18   ;;  %v387_v48 = vld [vmem:[%s858_s2 + $0x40] sm:$0xff] }
  0x17   : > { %614 = vmatpush.xpose.msk.msra.mxu3 %vm218_vm0, %v187_v2  ;;  %584 = vmatpush.xpose.msk.msra.mxu0 %vm218_vm0, %v187_v2 }
  0x1b   : > { %615 = vmatpush.xpose.msk.msra.mxu3 %vm218_vm0, %v186_v3  ;;  %585 = vmatpush.xpose.msk.msra.mxu0 %vm218_vm0, %v186_v3  ;;  %v385_v3 = vld [vmem:[%s857_s1 + $0x40] sm:$0xff] }
  0x1c   : > { %332 = vperm.xlu2 %640, %v318_v46  }
  0x1d   : > { %327 = vperm.xlu0 %638, %v317_v17  }
  0x1e   : > { %322 = vperm.xlu1 %639, %v316_v21  }
  0x1f   : > { %616 = vmatpush.xpose.msk.msra.mxu3 %vm218_vm0, %v185_v4  ;;  %586 = vmatpush.xpose.msk.msra.mxu0 %vm218_vm0, %v185_v4  ;;  %v386_v4 = vld [vmem:[%s857_s1 + $0x48] sm:$0xff] }
  0x23   : > { %617 = vmatpush.xpose.msk.msra.mxu3 %vm218_vm0, %v184_v5  ;;  %587 = vmatpush.xpose.msk.msra.mxu0 %vm218_vm0, %v184_v5 }
  0x24   : > { %391 = vperm.xlu2 %640, %v387_v48  }
  0x25   : > { %396 = vperm.xlu0 %638, %v388_v22  }
  0x27   : > { %618 = vmatpush.xpose.msk.msra.mxu3 %vm218_vm0, %v183_v6  ;;  %588 = vmatpush.xpose.msk.msra.mxu0 %vm218_vm0, %v183_v6 }
  0x2b   : > { %619 = vmatpush.xpose.msk.msra.mxu3 %vm218_vm0, %v182_v7  ;;  %589 = vmatpush.xpose.msk.msra.mxu0 %vm218_vm0, %v182_v7 }
  0x2f   : > { %620 = vmatpush.xpose.msk.msra.mxu3 %vm218_vm0, %v181_v8  ;;  %590 = vmatpush.xpose.msk.msra.mxu0 %vm218_vm0, %v181_v8 }
  0x33   : > { %621 = vmatpush.xpose.msk.msra.mxu3 %vm218_vm0, %v180_v10  ;;  %591 = vmatpush.xpose.msk.msra.mxu0 %vm218_vm0, %v180_v10 }
  0x37   : > { %622 = vmatpush.xpose.msk.msra.mxu3 %vm218_vm0, %v179_v12  ;;  %592 = vmatpush.xpose.msk.msra.mxu0 %vm218_vm0, %v179_v12 }
  0x3b   : > { %623 = vmatpush.xpose.msk.msra.mxu3 %vm218_vm0, %v178_v15  ;;  %593 = vmatpush.xpose.msk.msra.mxu0 %vm218_vm0, %v178_v15 }
  0x3f   : > { %624 = vmatpush.xpose.msk.msra.mxu3 %vm218_vm0, %v177_v16  ;;  %594 = vmatpush.xpose.msk.msra.mxu0 %vm218_vm0, %v177_v16 }
  0x43   : > { %625 = vmatpush.xpose.msk.msra.mxu3 %vm218_vm0, %v176_v19  ;;  %595 = vmatpush.xpose.msk.msra.mxu0 %vm218_vm0, %v176_v19 }
  0x47   : > { %626 = vmatpush.xpose.msk.msra.mxu3 %vm218_vm0, %v175_v20  ;;  %596 = vmatpush.xpose.msk.msra.mxu0 %vm218_vm0, %v175_v20 }
  0x4b   : > { %627 = vmatpush.xpose.msk.msra.mxu3 %vm218_vm0, %v174_v23  ;;  %597 = vmatpush.xpose.msk.msra.mxu0 %vm218_vm0, %v174_v23 }
  0x4e   : > { %599 = vmatmul.msk.f32.vlgmr.msra.gmra.mxu3 %vm218_vm0, %v191_v24  ;;  %598 = vmatmul.msk.f32.vlgmr.msra.gmra.mxu0 %vm218_vm0, %v190_v25 }
  0x56   : > { %600 = vmatmul.msk.f32.gmra.mxu3 %vm218_vm0, %v192_v26 }
  0x5e   : > { %601 = vmatmul.msk.f32.gmra.mxu3 %vm218_vm0, %v193_v27 }
  0x6e   : > { %v338_v53 = vpop.permute.xlu2 %337 }
  0x76   : > { %v333_v55 = vpop.permute.xlu2 %332 }
  0x7e   : > { %v392_v5 = vpop.permute.xlu2 %391 }
  0x7f   : > { %v216_v29 = vpop.permute.xlu0 %215 }
  0x80   : > { %v206_v31 = vpop.permute.xlu1 %205 }
  0x87   : > { %v211_v32 = vpop.permute.xlu0 %210 }
  0x88   : > { %v201_v39 = vpop.permute.xlu1 %200 }
  0x8f   : > { %v328_v59 = vpop.permute.xlu0 %327 }
  0x90   : > { %v323_v62 = vpop.permute.xlu1 %322 }
  0x97   : > { %v397_v10 = vpop.permute.xlu0 %396 }
  0xcb   : > { %v296_v36 = vpop.f32.mrf.mxu0 }
  0xcc   : > { %v297_v42 = vadd.f32 %v296_v36, %v201_v39 }
  0xce   : > { %v308_v44 = vmax.f32 %v297_v42, 0.0 }
  0xd1   : > { %v299_v28 = vpop.f32.mrf.mxu3 }
  0xd2   : > { %v300_v37 = vadd.f32 %v299_v28, %v206_v31 }
  0xd4   : > { %v309_v43 = vmax.f32 %v300_v37, 0.0 }
  0xd9   : > { %v302_v30 = vpop.f32.mrf.mxu3 }
  0xda   : > { %v303_v34 = vadd.f32 %v302_v30, %v211_v32 }
  0xdc   : > { %v310_v41 = vmax.f32 %v303_v34, 0.0 }
  0xe1   : > { %v305_v33 = vpop.f32.mrf.mxu3 }
  0xe2   : > { %v306_v35 = vadd.f32 %v305_v33, %v216_v29 }
  0xe4   : > { %v311_v38 = vmax.f32 %v306_v35, 0.0 }
  0xe6   : > { %364 = vmatpush.msra.mxu1 %v311_v38 }
  0xe8   : > { %365 = vmatpush.msra.mxu1 %v310_v41 }
  0xea   : > { %366 = vmatpush.msra.mxu1 %v309_v43 }
  0xec   : > { %367 = vmatpush.msra.mxu1 %v308_v44 }
  0xed   : > { %602 = vmatmul.msk.f32.vlgmr.msra.gmra.mxu1 %vm218_vm0, %v312_v45 }
  0xf5   : > { %603 = vmatmul.msk.f32.gmra.mxu1 %vm218_vm0, %v313_v47 }
  0xfd   : > { %604 = vmatmul.msk.f32.gmra.mxu1 %vm218_vm0, %v314_v49 }
 0x105   : > { %605 = vmatmul.msk.f32.gmra.mxu1 %vm218_vm0, %v315_v50 }
 0x16a   : > { %v369_v51 = vpop.f32.mrf.mxu1 }
 0x16b   : > { %v370_v63 = vadd.f32 %v369_v51, %v323_v62 }
 0x16d   : > { %v381_v2 = vmax.f32 %v370_v63, 0.0 }
 0x172   : > { %v372_v52 = vpop.f32.mrf.mxu1 }
 0x173   : > { %v373_v60 = vadd.f32 %v372_v52, %v328_v59 }
 0x175   : > { %v382_v1 = vmax.f32 %v373_v60, 0.0 }
 0x17a   : > { %v375_v54 = vpop.f32.mrf.mxu1 }
 0x17b   : > { %v376_v57 = vadd.f32 %v375_v54, %v333_v55 }
 0x17d   : > { %v383_v0 = vmax.f32 %v376_v57, 0.0 }
 0x182   : > { %v378_v56 = vpop.f32.mrf.mxu1 }
 0x183   : > { %v379_v58 = vadd.f32 %v378_v56, %v338_v53 }
 0x185   : > { %v384_v61 = vmax.f32 %v379_v58, 0.0 }
 0x187   : > { %417 = vmatpush.msra.mxu2 %v384_v61 }
 0x189   : > { %418 = vmatpush.msra.mxu2 %v383_v0 }
 0x18b   : > { %419 = vmatpush.msra.mxu2 %v382_v1 }
 0x18d   : > { %420 = vmatpush.msra.mxu2 %v381_v2 }
 0x18e   : > { %606 = vmatmul.msk.f32.vlgmr.msra.gmra.mxu2 %vm218_vm0, %v385_v3 }
 0x196   : > { %607 = vmatmul.msk.f32.gmra.mxu2 %vm218_vm0, %v386_v4 }
 0x211   : > { %v422_v6 = vpop.f32.mrf.mxu2 }
 0x212   : > { %v423_v7 = vadd.f32 %v422_v6, %v392_v5 }
 0x214   : > { %v608_v8 = vmul.f32 -5.0, %v423_v7 }
 0x216   : > { %v432_v9 = vmul.f32 1.442695, %v608_v8 }
 0x218   : > { %641 = vpow2.f32 %v432_v9 }
 0x219   : > { %v425_v11 = vpop.f32.mrf.mxu2 }
 0x21a   : > { %v426_v12 = vadd.f32 %v425_v11, %v397_v10 }
 0x21c   : > { %v609_v13 = vmul.f32 -5.0, %v426_v12 }
 0x21e   : > { %v642_v14 = vpop.eup %641  ;;  %v434_v15 = vmul.f32 1.442695, %v609_v13 }
 0x21f   : > { %v436_v16 = vadd.f32 1.0, %v642_v14 }
 0x220   : > { %643 = vpow2.f32 %v434_v15 }
 0x221   : > { %645 = vrcp.f32 %v436_v16  ;;  %v449_v22 = vand.u32 2147483648, %v436_v16  ;;  %v447_v24 = vand.u32 2147483647, %v436_v16  ;;  %vm443_vm2 = vweird.f32 %v436_v16 }
 0x223   : > { %v450_v27 = vor.u32 1.1754944e-38, %v449_v22  ;;  %vm448_vm4 = vcmp.eq.f32.partialorder %v447_v24, 8.507059e+37 }
 0x226   : > { %v644_v17 = vpop.eup %643 }
 0x227   : > { %v646_v18 = vpop.eup %645  ;;  %v437_v19 = vadd.f32 1.0, %v644_v17 }
 0x228   : > { %v439_v20 = vmul.f32 %v646_v18, %v436_v16  ;;  %vm444_vm1 = vweird.f32 %v646_v18 }
 0x229   : > { %647 = vrcp.f32 %v437_v19  ;;  %vm445_vm3 = vmor %vm443_vm2, %vm444_vm1  ;;  %v464_v32 = vand.u32 2147483648, %v437_v19  ;;  %v462_v34 = vand.u32 2147483647, %v437_v19  ;;  %vm458_vm6 = vweird.f32 %v437_v19 }
 0x22a   : > { %v440_v21 = vsub.f32 1.0, %v439_v20 }
 0x22b   : > { %v465_v36 = vor.u32 1.1754944e-38, %v464_v32  ;;  %vm463_vm8 = vcmp.eq.f32.partialorder %v462_v34, 8.507059e+37 }
 0x22c   : > { %v441_v23 = vmul.f32 %v646_v18, %v440_v21 }
 0x22e   : > { %v442_v25 = vadd.f32 %v646_v18, %v441_v23 }
 0x22f   : > { %v648_v26 = vpop.eup %647 }
 0x230   : > { %v446_v28 = vsel %vm445_vm3, %v646_v18, %v442_v25  ;;  %v454_v29 = vmul.f32 %v648_v26, %v437_v19  ;;  %vm459_vm5 = vweird.f32 %v648_v26 }
 0x231   : > { %v451_v30 = vsel %vm448_vm4, %v450_v27, %v446_v28  ;;  %vm460_vm7 = vmor %vm458_vm6, %vm459_vm5 }
 0x232   : > { %468 = vxpose.xlu1.b32.start [1/2] (short) %v451_v30, 128  ;;  %v455_v31 = vsub.f32 1.0, %v454_v29 }
 0x234   : > { %v456_v33 = vmul.f32 %v648_v26, %v455_v31 }
 0x236   : > { %v457_v35 = vadd.f32 %v648_v26, %v456_v33 }
 0x238   : > { %v461_v37 = vsel %vm460_vm7, %v648_v26, %v457_v35 }
 0x239   : > { %v466_v38 = vsel %vm463_vm8, %v465_v36, %v461_v37 }
 0x23a   : > { %469 = vxpose.xlu1.b32.end [2/2] (short) %v466_v38, 128 }
 0x2d6   : > { %v484_v39 = vpop.trf.xlu1 }
 0x2d7   : > { %501 = vst.msk [vmem:[%s819_s10] sm:$0xff] %vm500_vm9, %v484_v39 }
 0x2de   : > { %v485_v40 = vpop.trf.xlu1 }
 0x2df   : > { %502 = vst.msk [vmem:[%s819_s10 + $0x8] sm:$0xff] %vm500_vm9, %v485_v40 }
 0x2e6   : > { %v486_v41 = vpop.trf.xlu1 }
 0x2e7   : > { %503 = vst.msk [vmem:[%s819_s10 + $0x10] sm:$0xff] %vm500_vm9, %v486_v41 }
 0x2ee   : > { %v487_v42 = vpop.trf.xlu1 }
 0x2ef   : > { %504 = vst.msk [vmem:[%s819_s10 + $0x18] sm:$0xff] %vm500_vm9, %v487_v42 }
 0x2f6   : > { %v488_v43 = vpop.trf.xlu1 }
 0x2f7   : > { %505 = vst.msk [vmem:[%s819_s10 + $0x20] sm:$0xff] %vm500_vm9, %v488_v43 }
 0x2fe   : > { %v489_v44 = vpop.trf.xlu1 }
 0x2ff   : > { %506 = vst.msk [vmem:[%s819_s10 + $0x28] sm:$0xff] %vm500_vm9, %v489_v44 }
 0x306   : > { %v490_v45 = vpop.trf.xlu1 }
 0x307   : > { %507 = vst.msk [vmem:[%s819_s10 + $0x30] sm:$0xff] %vm500_vm9, %v490_v45 }
 0x30e   : > { %v491_v46 = vpop.trf.xlu1 }
 0x30f   : > { %508 = vst.msk [vmem:[%s819_s10 + $0x38] sm:$0xff] %vm500_vm9, %v491_v46 }
 0x316   : > { %v492_v47 = vpop.trf.xlu1 }
 0x317   : > { %509 = vst.msk [vmem:[%s819_s10 + $0x40] sm:$0xff] %vm500_vm9, %v492_v47 }
 0x31e   : > { %v493_v48 = vpop.trf.xlu1 }
 0x31f   : > { %510 = vst.msk [vmem:[%s819_s10 + $0x48] sm:$0xff] %vm500_vm9, %v493_v48 }
 0x326   : > { %v494_v49 = vpop.trf.xlu1 }
 0x327   : > { %511 = vst.msk [vmem:[%s819_s10 + $0x50] sm:$0xff] %vm500_vm9, %v494_v49 }
 0x32e   : > { %v495_v50 = vpop.trf.xlu1 }
 0x32f   : > { %512 = vst.msk [vmem:[%s819_s10 + $0x58] sm:$0xff] %vm500_vm9, %v495_v50 }
 0x336   : > { %v496_v51 = vpop.trf.xlu1 }
 0x337   : > { %513 = vst.msk [vmem:[%s819_s10 + $0x60] sm:$0xff] %vm500_vm9, %v496_v51 }
 0x33e   : > { %v497_v52 = vpop.trf.xlu1 }
 0x33f   : > { %514 = vst.msk [vmem:[%s819_s10 + $0x68] sm:$0xff] %vm500_vm9, %v497_v52 }
 0x346   : > { %v498_v53 = vpop.trf.xlu1 }
 0x347   : > { %515 = vst.msk [vmem:[%s819_s10 + $0x70] sm:$0xff] %vm500_vm9, %v498_v53 }
 0x34e   : > { %v499_v54 = vpop.trf.xlu1 }
 0x34f   : > { %516 = vst.msk [vmem:[%s819_s10 + $0x78] sm:$0xff] %vm500_vm9, %v499_v54 }
 0x350 PF: > { %s13_s12 = sadd.s32 1, %s655_s12  }
 0x351   : > { %p10_p4 = scmp.ge.s32.totalorder %s13_s12, 4  }
 0x353   :  { %12 = sbr.rel (!%p10_p4) target bundleno = 1 (0x1), region = 62 }

</bundles_post_ra>
